<compile_context>
chip_gen: v7x
topology: tpu7x:2x2x1
jax: 0.10.0
libtpu: 0.0.40
codegen_flags: <defaults>
</compile_context>

<pallas_src>
import functools

import jax
import jax.numpy as jnp
from jax import lax
from jax.experimental import pallas as pl
from jax.experimental.pallas import tpu as pltpu


def _round_up(n, m):
    return (n + m - 1) // m * m


def _linear_kernel(x_ref, w_ref, b_ref, o_ref, *, precision):
    # y = x @ W + b : MXU matmul with f32 accumulation + VPU broadcast bias add.
    acc = jnp.dot(
        x_ref[...], w_ref[...],
        preferred_element_type=jnp.float32, precision=precision,
    )
    o_ref[...] = (acc + b_ref[...].astype(jnp.float32)).astype(o_ref.dtype)


def patch_projection(x, weight, bias, *, compute_dtype=None, tm_target=1024):
    """x: [B, S, P], weight: [P, E], bias: [E] -> [B, S, E]  (== nn.Linear).

    compute_dtype=jnp.bfloat16 casts x/weight to bf16 before the kernel
    (halves input DMA bytes; recommended v6e/v7x).  Default keeps the input
    dtype and uses a true-f32 MXU matmul.
    # TODO(synk): if this projection is ever int8-quantized, note v7x's MXU is
    # fp8-only (no int8) -- plan the quantized variant as fp8/bf16.
    """
    B, S, P = x.shape
    E = weight.shape[1]
    M = B * S

    x2d = x.reshape(M, P)                       # metadata reshape, no copy
    if compute_dtype is not None and compute_dtype != x.dtype:
        x2d = x2d.astype(compute_dtype)
        weight = weight.astype(compute_dtype)
    out_dtype = x.dtype
    b2d = bias.reshape(1, E)

    precision = (
        lax.Precision.HIGHEST if x2d.dtype == jnp.float32 else lax.Precision.DEFAULT
    )

    # --- choose M tile size --------------------------------------------------
    in_sz = x2d.dtype.itemsize
    w_sz = weight.dtype.itemsize
    out_sz = jnp.dtype(out_dtype).itemsize
    budget = 40 * 1024 * 1024                   # fits v7x (64 MiB VMEM) easily

    tm = max(8, min(tm_target, _round_up(M, 8)))

    def _footprint(t):
        return (2 * t * P * in_sz               # double-buffered x tiles
                + 2 * t * E * out_sz            # double-buffered out tiles
                + P * E * w_sz                  # single-buffered weight
                + 2 * E * 4)                    # bias
    while _footprint(tm) > budget and tm > 8:
        tm = max(8, _round_up(tm // 2, 8))

    # If one tile would cover all of a non-trivial M, split it so the
    # "parallel" grid has >= 2 steps (keeps both v7x TensorCores busy).
    if M > 256 and pl.cdiv(M, tm) == 1:
        tm = _round_up(pl.cdiv(M, 2), 8)

    grid = (pl.cdiv(M, tm),)                    # ragged last tile is clipped

    flops = 2 * M * P * E
    bytes_accessed = (
        x2d.size * in_sz + weight.size * w_sz
        + b2d.size * b2d.dtype.itemsize + M * E * out_sz
    )

    out2d = pl.pallas_call(
        functools.partial(_linear_kernel, precision=precision),
        out_shape=jax.ShapeDtypeStruct((M, E), out_dtype),
        grid=grid,
        in_specs=[
            # x marches over M; last block dim is the true P (full array dim,
            # legal even when < 128 -- no 8x DMA blowup from padding).
            pl.BlockSpec((tm, P), lambda i: (i, 0)),
            # Grid-invariant weight / bias: DMA'd once, single-buffered.
            pl.BlockSpec((P, E), lambda i: (0, 0), pipeline_mode=pl.Buffered(1)),
            pl.BlockSpec((1, E), lambda i: (0, 0), pipeline_mode=pl.Buffered(1)),
        ],
        out_specs=pl.BlockSpec((tm, E), lambda i: (i, 0)),
        compiler_params=pltpu.CompilerParams(
            dimension_semantics=("parallel",),   # megacore-shardable M axis
            vmem_limit_bytes=48 * 1024 * 1024,
        ),
        cost_estimate=pl.CostEstimate(
            flops=flops, transcendentals=0, bytes_accessed=bytes_accessed
        ),
    )(x2d, weight, b2d)

    return out2d.reshape(B, S, E)


if __name__ == "__main__":
    # Small shapes consistent with the module: a batch of patch sequences.
    batch, seq, patch_size, emb_dim = 2, 8, 16, 32

    key = jax.random.PRNGKey(0)
    kx, kw, kb = jax.random.split(key, 3)

    x = jax.random.normal(kx, (batch, seq, patch_size), dtype=jnp.float32)

    # Deterministic init matching torch.nn.Linear's U(-1/sqrt(in), 1/sqrt(in)).
    bound = 1.0 / (patch_size ** 0.5)
    weight = jax.random.uniform(
        kw, (patch_size, emb_dim), dtype=jnp.float32, minval=-bound, maxval=bound
    )
    bias = jax.random.uniform(
        kb, (emb_dim,), dtype=jnp.float32, minval=-bound, maxval=bound
    )

    ref = x @ weight + bias

    # f32 path: nn.Linear semantics with true-f32 MXU passes.
    out = jax.block_until_ready(patch_projection(x, weight, bias))
    assert out.shape == (batch, seq, emb_dim)
    assert jnp.allclose(out, ref, atol=1e-5, rtol=1e-5)

    # bf16-input / f32-accumulate fast path (recommended on v6e/v7x).
    out_bf16 = jax.block_until_ready(
        patch_projection(x, weight, bias, compute_dtype=jnp.bfloat16)
    )
    assert out_bf16.shape == (batch, seq, emb_dim)
    assert jnp.allclose(out_bf16, ref, atol=2e-2, rtol=2e-2)

    print("KERNEL_OK")
</pallas_src>

<mosaic_0001>
module attributes {stable_mosaic.version = 11 : i64} {
  func.func @_linear_kernel(%arg0: i32, %arg1: memref<16x16xf32, #tpu.memory_space<vmem>>, %arg2: memref<16x32xf32, #tpu.memory_space<vmem>>, %arg3: memref<1x32xf32, #tpu.memory_space<vmem>>, %arg4: memref<16x32xf32, #tpu.memory_space<vmem>>) attributes {dimension_semantics = [#tpu.dimension_semantics<parallel>], iteration_bounds = array<i64: 1>, scalar_prefetch = 0 : i64, scratch_operands = 0 : i64, tpu.core_type = #tpu.core_type<tc>, window_params = [{transform_indices = @transform_0, window_bounds = array<i64: 16, 16>}, {pipeline_mode = #tpu.pipeline_mode<synchronous>, transform_indices = @transform_1, window_bounds = array<i64: 16, 32>}, {pipeline_mode = #tpu.pipeline_mode<synchronous>, transform_indices = @transform_2, window_bounds = array<i64: 1, 32>}, {transform_indices = @transform_3, window_bounds = array<i64: 16, 32>}]} {
    %c0 = arith.constant 0 : index
    %c0_0 = arith.constant 0 : index
    %0 = vector.load %arg1[%c0, %c0_0] : memref<16x16xf32, #tpu.memory_space<vmem>>, vector<16x16xf32>
    %c0_1 = arith.constant 0 : index
    %c0_2 = arith.constant 0 : index
    %1 = vector.load %arg2[%c0_1, %c0_2] : memref<16x32xf32, #tpu.memory_space<vmem>>, vector<16x32xf32>
    %cst = arith.constant dense<0.000000e+00> : vector<16x32xf32>
    %2 = tpu.matmul %0, %1, %cst {dimension_numbers = #tpu.dot_dimension_numbers<[1], [0], [0], [1], [0, 0, 1, 1], [], []>, precision = #tpu.contract_precision<fp32>} : vector<16x16xf32>, vector<16x32xf32>, vector<16x32xf32> -> vector<16x32xf32>
    %c0_3 = arith.constant 0 : index
    %c0_4 = arith.constant 0 : index
    %3 = vector.load %arg3[%c0_3, %c0_4] : memref<1x32xf32, #tpu.memory_space<vmem>>, vector<1x32xf32>
    %4 = vector.broadcast %3 : vector<1x32xf32> to vector<16x32xf32>
    %5 = arith.addf %2, %4 : vector<16x32xf32>
    %c0_5 = arith.constant 0 : index
    %c0_6 = arith.constant 0 : index
    %6 = vector.load %arg4[%c0_5, %c0_6] : memref<16x32xf32, #tpu.memory_space<vmem>>, vector<16x32xf32>
    tpu.vector_store %arg4[%c0_5, %c0_6], %5 {strides = array<i32>} : memref<16x32xf32, #tpu.memory_space<vmem>>, vector<16x32xf32>,
    return
  }
  func.func @transform_0(%arg0: i32) -> (i32, i32) {
    %c0_i32 = arith.constant 0 : i32
    %c0_i32_0 = arith.constant 0 : i32
    return %arg0, %c0_i32 : i32, i32
  }
  func.func @transform_1(%arg0: i32) -> (i32, i32) {
    %c0_i32 = arith.constant 0 : i32
    %c0_i32_0 = arith.constant 0 : i32
    %c0_i32_1 = arith.constant 0 : i32
    return %c0_i32, %c0_i32_0 : i32, i32
  }
  func.func @transform_2(%arg0: i32) -> (i32, i32) {
    %c0_i32 = arith.constant 0 : i32
    %c0_i32_0 = arith.constant 0 : i32
    %c0_i32_1 = arith.constant 0 : i32
    return %c0_i32, %c0_i32_0 : i32, i32
  }
  func.func @transform_3(%arg0: i32) -> (i32, i32) {
    %c0_i32 = arith.constant 0 : i32
    %c0_i32_0 = arith.constant 0 : i32
    return %arg0, %c0_i32 : i32, i32
  }
}

</mosaic_0001>

<bundles_post_ra>
// kernel: tpu_custom_call.1
= control target key start
LH: loop header
LB: loop body
LE: loop exit
PB: predicated region body
PF: predicated region fallthrough
CT: control target
= control target key end

     0   :  { %8 = vsyncpa [#allocation3], 0  ;;  %s837_s0 = inlined_call_operand.hbm [shape: f32[16,16], index: 0, kind: input, shape index: {}]   ;;  %s838_s1 = inlined_call_operand.hbm [shape: f32[16,32], index: 1, kind: input, shape index: {}]   ;;  %s839_s2 = inlined_call_operand.vmem [shape: f32[1,32], index: 2, kind: input, shape index: {}]   ;;  %s840_s3 = inlined_call_operand.hbm [shape: f32[16,32], index: 3, kind: output, shape index: {}]  }
   0x1   :  { %9 = vsyncpa [#allocation6], 0 }
   0x2   :  { %10 = vsyncpa [#allocation4], 0  ;;  %s764_s12 = smov [#allocation2]   ;;  %s692_s16 = scalar_lea.hbm %s837_s0, 256 }
   0x3   :  { %s16_s13 = sshll.u32 %s764_s12, 4  ;;  %p693_p0 = scmp.ne.s32.totalorder %s837_s0, %s692_s16  ;;  %s17_s13 = int_to_ptr.vmem [resolvable:$true] %s16_s13 }
   0x4   :  { %p696_p1 = scmp.lt.u32.totalorder %s692_s16, %s837_s0 }
   0x6   :  { %p698_p2 = pnand %p696_p1, %p693_p0 }
   0x8   :  { %701 = shalt.err (!%p698_p2)
}
   0x9   :  { %s702_s21 = scalar_lea.vmem %s17_s13, 256  ;;  %p707_p4 = scmp.lt.s32.totalorder %s17_s13, %s17_s13 }
   0xa   :  { %p703_p3 = scmp.ne.s32.totalorder %s17_s13, %s702_s21  ;;  %p708_p5 = scmp.lt.s32.totalorder %s702_s21, %s702_s21 }
   0xc   :  { %p709_p6 = por %p708_p5, %p707_p4 }
   0xe   :  { %p710_p7 = pnand %p709_p6, %p703_p3 }
  0x10   :  { %713 = shalt.err (!%p710_p7)
}
  0x11   :  { %s765_s22 = smov 128   ;;  %s766_s23 = smov 8  }
  0x12   :  { %22 = dma.hbm_to_vmem [thread:$0]  %s837_s0, 256, %s17_s13, [#allocation3], %s765_s22, %s765_s22, %s766_s23  }
  0x13   :  { %s767_s26 = smov [#allocation5]   ;;  %s714_s30 = scalar_lea.hbm %s838_s1, 256 }
  0x14   :  { %s28_s27 = sshll.u32 %s767_s26, 4  ;;  %p715_p8 = scmp.ne.s32.totalorder %s838_s1, %s714_s30  ;;  %s29_s27 = int_to_ptr.vmem [resolvable:$true] %s28_s27 }
  0x15   :  { %p718_p9 = scmp.lt.u32.totalorder %s714_s30, %s838_s1 }
  0x17   :  { %p720_p10 = pnand %p718_p9, %p715_p8 }
  0x19   :  { %723 = shalt.err (!%p720_p10)
}
  0x1a   :  { %s724_s8 = scalar_lea.vmem %s29_s27, 256  ;;  %p729_p12 = scmp.lt.s32.totalorder %s29_s27, %s29_s27 }
  0x1b   :  { %p725_p11 = scmp.ne.s32.totalorder %s29_s27, %s724_s8  ;;  %p730_p13 = scmp.lt.s32.totalorder %s724_s8, %s724_s8 }
  0x1d   :  { %p731_p0 = por %p730_p13, %p729_p12 }
  0x1f   :  { %p732_p1 = pnand %p731_p0, %p725_p11 }
  0x21   :  { %735 = shalt.err (!%p732_p1)
}
  0x22   :  { %34 = dma.hbm_to_vmem [thread:$0]  %s838_s1, 256, %s29_s27, [#allocation6], %s765_s22, %s765_s22, %s766_s23  }
  0x23   :  { %758 = dma.done.wait [#allocation3], 256  }
  0x24   :  { %759 = vsyncadd [#allocation3], 4294967040 }
  0x25   :  { %760 = dma.done.wait [#allocation6], 256  }
  0x26   :  { %761 = vsyncadd [#allocation6], 4294967040  ;;  %vm54_vm0 = vcmask 130048   ;;  %v45_v0 = vld [vmem:[#allocation5] sm:$0xff]  ;;  %v46_v1 = vld [vmem:[#allocation5 + $0x8] sm:$0xff]  ;;  %s768_s11 = smov [#allocation7]  }
  0x27   :  { %v43_v2 = vld [vmem:[#allocation2] sm:$0xff]  ;;  %v62_v3 = vand.u32 4294901760, %v45_v0  ;;  %v65_v4 = vand.u32 4294901760, %v46_v1  ;;  %v44_v5 = vld [vmem:[#allocation2 + $0x8] sm:$0xff]  ;;  %s571_s12 = sshll.u32 %s768_s11, 4  ;;  %vm563_vm1 = vcmask 261120   ;;  %s572_s12 = int_to_ptr.vmem [resolvable:$true] %s571_s12 }
  0x28   :  { %v56_v6 = vsel %vm54_vm0, %v43_v2, 0  ;;  %v59_v7 = vsel %vm54_vm0, %v44_v5, 0  ;;  %v584_v32 = vld [vmem:[%s839_s2] ss:$0 sm:$0xff]  ;;  %s736_s13 = scalar_lea.vmem %s572_s12, 256  ;;  %p741_p3 = scmp.lt.s32.totalorder %s572_s12, %s572_s12 }
  0x29   :  { %v128_v8 = vand.u32 4294901760, %v56_v6  ;;  %v651_v9 = vpack.c.bf16 %v65_v4, %v62_v3  ;;  %v138_v10 = vand.u32 4294901760, %v59_v7  ;;  %v150_v11 = vsub.f32 %v45_v0, %v62_v3  ;;  %p737_p2 = scmp.ne.s32.totalorder %s572_s12, %s736_s13  ;;  %p742_p4 = scmp.lt.s32.totalorder %s736_s13, %s736_s13 }
  0x2a   :  { %v157_v12 = vsub.f32 %v46_v1, %v65_v4 }
  0x2b   :  { %v129_v13 = vsub.f32 %v56_v6, %v128_v8  ;;  %664 = vmatprep.subr.bf16.mxu0 %v651_v9  ;;  %652 = vmatprep.subr.bf16.mxu1 %v651_v9  ;;  %v139_v14 = vsub.f32 %v59_v7, %v138_v10  ;;  %v151_v15 = vand.u32 4294901760, %v150_v11  ;;  %p743_p5 = por %p742_p4, %p741_p3 }
  0x2c   :  { %v158_v16 = vand.u32 4294901760, %v157_v12  ;;  %666 = vmatpush3.bf16.msra.mxu0 %v651_v9  ;;  %654 = vmatpush3.bf16.msra.mxu1 %v651_v9  ;;  %v659_v29 = vpack.c.bf16 %v157_v12, %v150_v11 }
  0x2d   :  { %v130_v17 = vand.u32 4294901760, %v129_v13  ;;  %v140_v18 = vand.u32 4294901760, %v139_v14  ;;  %v152_v19 = vsub.f32 %v150_v11, %v151_v15  ;;  %p744_p6 = pnand %p743_p5, %p737_p2 }
  0x2e   :  { %v159_v20 = vsub.f32 %v157_v12, %v158_v16  ;;  %v667_v21 = vpack.c.bf16 %v158_v16, %v151_v15 }
  0x2f   :  { %634 = vmatprep.mubr.f32.mxu0 %v130_v17  ;;  %v131_v22 = vsub.f32 %v129_v13, %v130_v17  ;;  %v141_v23 = vsub.f32 %v139_v14, %v140_v18  ;;  %v153_v24 = vand.u32 4294901760, %v152_v19 }
  0x30   :  { %635 = vmatmul.mubr.f32.vlgmr.msra.gmra.mrb[0].mxu0 %v140_v18  ;;  %v160_v25 = vand.u32 4294901760, %v159_v20  ;;  %668 = vmatprep.subr.bf16.mxu0 %v667_v21 }
  0x31   :  { %v132_v26 = vand.u32 4294901760, %v131_v22  ;;  %670 = vmatpush3.bf16.msra.mxu0 %v667_v21  ;;  %641 = vmatprep.mubr.f32.mxu0 %v128_v8  ;;  %v142_v27 = vand.u32 4294901760, %v141_v23 }
  0x32   :  { %v655_v28 = vpack.c.bf16 %v160_v25, %v153_v24  ;;  %672 = vmatprep.subr.bf16.mxu0 %v651_v9 }
  0x33   :  { %613 = vmatprep.mubr.f32.mxu1 %v132_v26 }
  0x34   :  { %614 = vmatmul.mubr.f32.vlgmr.msra.gmra.mrb[0].mxu1 %v142_v27  ;;  %656 = vmatprep.subr.bf16.mxu1 %v655_v28 }
  0x35   :  { %658 = vmatpush3.bf16.msra.mxu1 %v655_v28  ;;  %620 = vmatprep.mubr.f32.mxu1 %v128_v8 }
  0x36   :  { %660 = vmatprep.subr.bf16.mxu1 %v659_v29 }
  0x38   :  { %642 = vmatmul.mubr.f32.vlgmr.msra.gmra.mrb[0].mxu0 %v138_v10 }
  0x39   :  { %674 = vmatpush3.bf16.msra.mxu0 %v651_v9  ;;  %648 = vmatprep.mubr.f32.mxu0 %v128_v8 }
  0x3c   :  { %621 = vmatmul.mubr.f32.vlgmr.msra.gmra.mrb[0].mxu1 %v138_v10 }
  0x3d   :  { %662 = vmatpush3.bf16.msra.mxu1 %v659_v29  ;;  %627 = vmatprep.mubr.f32.mxu1 %v129_v13 }
  0x40   :  { %649 = vmatmul.mubr.f32.vlgmr.msra.gmra.mrb[0].mxu0 %v138_v10 }
  0x44   :  { %628 = vmatmul.mubr.f32.vlgmr.msra.gmra.mrb[0].mxu1 %v139_v14 }
 0x113   :  { %v650_v30 = vpop.f32.mrb[0].mxu0 }
 0x114   :  { %v553_v31 = vpop.f32.mrb[1].mxu0 }
 0x117   :  { %v629_v33 = vpop.f32.mrb[0].mxu1 }
 0x118   :  { %v675_v34 = vadd.f32 %v629_v33, %v584_v32  ;;  %v307_v35 = vpop.f32.mrb[1].mxu1 }
 0x119   :  { %v677_v36 = vadd.f32 %v584_v32, %v307_v35 }
 0x11a   :  { %v676_v37 = vadd.f32 %v675_v34, %v650_v30 }
 0x11b   :  { %v678_v38 = vadd.f32 %v677_v36, %v553_v31 }
 0x11c   :  { %565 = vst.msk [vmem:[#allocation7 + $0x8] sm:$0xff] %vm563_vm1, %v676_v37 }
 0x11d   :  { %564 = vst.msk [vmem:[#allocation7] sm:$0xff] %vm563_vm1, %v678_v38 }
 0x11e   :  { %747 = shalt.err (!%p744_p6)
}
 0x11f   :  { %s748_s15 = scalar_lea.hbm %s840_s3, 256 }
 0x120   :  { %p749_p7 = scmp.ne.s32.totalorder %s840_s3, %s748_s15  ;;  %p752_p8 = scmp.lt.u32.totalorder %s748_s15, %s840_s3 }
 0x122   :  { %p754_p9 = pnand %p752_p8, %p749_p7 }
 0x124   :  { %757 = shalt.err (!%p754_p9)
}
 0x125   :  { %577 = dma.vmem_to_hbm [thread:$0]  %s572_s12, 256, %s840_s3, [#allocation4], %s765_s22, %s765_s22, %s766_s23  }
 0x126   :  { %762 = dma.done.wait [#allocation4], 256  }
 0x127   :  { %763 = vsyncadd [#allocation4], 4294967040 }
 0x128   :  { %581 = vsyncpa [#allocation3], 1 }
 0x129   :  { %582 = vsyncpa [#allocation6], 1 }
 0x12a   :  { %583 = vsyncpa [#allocation4], 1 }

</bundles_post_ra>
